<compile_context>
chip_gen: v7x
topology: tpu7x:2x2x1
jax: 0.10.0
libtpu: 0.0.40
codegen_flags: <defaults>
</compile_context>

<pallas_src>
import functools

import numpy as np
import jax
import jax.numpy as jnp
from jax.experimental import pallas as pl
from jax.experimental.pallas import tpu as pltpu


# ----------------------------- Pallas kernels ------------------------------

def conv_xflat_kernel(patches_ref, weff_ref, beff_ref, xflat_ref):
    """One-shot: im2col conv (MXU) + folded BN + LeakyReLU, repacked to the
    PyTorch x.reshape(B, -1) layout. Runs once (hoisted out of the t grid)."""
    cout = weff_ref.shape[0]
    B, F = xflat_ref.shape
    dhw = patches_ref.shape[1] // B

    # conv as (Cout, Kp) @ (Kp, B*DHW) on the MXU; BN-folded bias + LeakyReLU
    y = jnp.dot(weff_ref[...], patches_ref[...], preferred_element_type=jnp.float32)
    y = y + beff_ref[...]                               # (Cout, B*DHW) + (Cout, 1)
    y = jnp.where(y >= 0.0, y, 0.01 * y)                # LeakyReLU(negative_slope=1e-2)

    # (Cout, B*DHW) -> (B, Cout*DHW): lane-aligned static slice copies (once)
    for c in range(cout):
        for b in range(B):
            xflat_ref[pl.ds(b, 1), pl.ds(c * dhw, dhw)] = y[c:c + 1, b * dhw:(b + 1) * dhw]


def hx_kernel(tids_ref, xflat_ref, vars_ref, w1x_ref, w1v_ref, w1t_ref, b1_ref, hx_ref):
    """Grid (t, hid-chunk), both parallel: hx = x_flat @ W1_x[t] (+ all
    row-constant Linear1 terms folded in so kernel 2 stays minimal)."""
    t = pl.program_id(0)

    # row-constant columns of Linear1: vars @ W1_v[t] + task_id * w1_t[t] + b1[t]
    hrow = jnp.dot(vars_ref[...], w1v_ref[0], preferred_element_type=jnp.float32)
    hrow = hrow + tids_ref[t].astype(jnp.float32) * w1t_ref[0]
    hrow = hrow + b1_ref[0]                                              # (1, HIDC)

    hx_ref[0] = jnp.dot(xflat_ref[...].astype(jnp.bfloat16), w1x_ref[0],
                        preferred_element_type=jnp.float32) + hrow       # (B, HIDC)


def mu_update_kernel(hx_ref, means_in_ref, w1m_ref, w2_ref, b2_ref,
                     means_out_ref, *, momentum):
    """One grid step == one component t: serial part of the MLP + momentum update.

    means_out is a VMEM-resident accumulator (same output block every step), so
    step t+1 sees the means row updated at step t, like the torch loop.
    This grid axis MUST stay 'arbitrary' (never megacore-sharded)."""
    t = pl.program_id(0)
    nc, fs = means_out_ref.shape

    @pl.when(t == 0)
    def _init():
        means_out_ref[...] = means_in_ref[...]

    # current (sequentially updated) means contribution: sum of nc small K=fs
    # dots — no flatten scratch, no masked sub-lane stores.
    w1m = w1m_ref[0].astype(jnp.float32)                 # (nc, fs, HIDP), bf16 -> f32
    hrow = jnp.dot(means_out_ref[pl.ds(0, 1), :], w1m[0],
                   preferred_element_type=jnp.float32)
    for r in range(1, nc):
        hrow = hrow + jnp.dot(means_out_ref[pl.ds(r, 1), :], w1m[r],
                              preferred_element_type=jnp.float32)        # (1, HIDP)

    h = jnp.maximum(hx_ref[0] + hrow, 0.0)               # ReLU(Linear1), (B, HIDP)
    o = jnp.dot(h.astype(jnp.bfloat16), w2_ref[0],
                preferred_element_type=jnp.float32) + b2_ref[0]          # (B, fs)
    o = jnp.tanh(o)

    mu_hat = jnp.mean(o, axis=0, keepdims=True)          # .mean(0)
    old = means_out_ref[pl.ds(t, 1), :]
    means_out_ref[pl.ds(t, 1), :] = (1.0 - momentum) * mu_hat + momentum * old


# ------------------------------- wrappers -----------------------------------

def conv_xflat_pallas(x, params):
    """x: (B, 1, D, H, W) f32 -> x_flat: (B, F) f32 == prompt_conv(x).reshape(B,-1)."""
    B, cin, D, H, W = x.shape
    assert cin == 1
    dhw = D * H * W
    cout, ktaps_pad = params["w_eff"].shape
    F = cout * dhw

    # im2col in the wrapper (layout plumbing): (27, B*DHW), K zero-padded -> 32
    xp = jnp.pad(x[:, 0], ((0, 0), (1, 1), (1, 1), (1, 1)))
    taps = [xp[:, kd:kd + D, kh:kh + H, kw:kw + W]
            for kd in range(3) for kh in range(3) for kw in range(3)]
    patches = jnp.stack(taps, axis=0).reshape(27, B * dhw)
    patches = jnp.pad(patches, ((0, ktaps_pad - 27), (0, 0)))

    return pl.pallas_call(
        conv_xflat_kernel,
        out_shape=jax.ShapeDtypeStruct((B, F), jnp.float32),
    )(patches, params["w_eff"], params["b_eff"])


def hx_pallas(x_flat, vars_, tids, params, n_hid_chunks=2):
    """hx[t] = x_flat @ W1_x[t] + vars @ W1_v[t] + tid[t]*w1_t[t] + b1[t]."""
    B, F = x_flat.shape
    w1x = params["w1x"]                                   # (T, F, HIDP) bf16
    T, _, HIDP = w1x.shape
    nc = int(vars_.shape[0])
    HIDC = HIDP // n_hid_chunks
    assert HIDC * n_hid_chunks == HIDP and HIDC % 128 == 0
    vars2 = vars_.reshape(1, nc).astype(jnp.float32)

    grid_spec = pltpu.PrefetchScalarGridSpec(
        num_scalar_prefetch=1,                            # tids -> SMEM
        grid=(T, n_hid_chunks),
        in_specs=[
            pl.BlockSpec((B, F),        lambda t, h, tids: (0, 0)),      # x_flat (t-invariant)
            pl.BlockSpec((1, nc),       lambda t, h, tids: (0, 0)),      # vars
            pl.BlockSpec((1, F, HIDC),  lambda t, h, tids: (t, 0, h)),   # W1 x-cols (bf16)
            pl.BlockSpec((1, nc, HIDC), lambda t, h, tids: (t, 0, h)),   # W1 vars cols
            pl.BlockSpec((1, 1, HIDC),  lambda t, h, tids: (t, 0, h)),   # W1 task_id col
            pl.BlockSpec((1, 1, HIDC),  lambda t, h, tids: (t, 0, h)),   # b1
        ],
        out_specs=pl.BlockSpec((1, B, HIDC), lambda t, h, tids: (t, 0, h)),
    )
    return pl.pallas_call(
        hx_kernel,
        out_shape=jax.ShapeDtypeStruct((T, B, HIDP), jnp.float32),
        grid_spec=grid_spec,
        compiler_params=pltpu.CompilerParams(
            dimension_semantics=("parallel", "parallel")),
    )(tids, x_flat, vars2, w1x, params["w1v"], params["w1t"], params["b1"])


def mu_momentum_update_pallas(hx, means, params, momentum):
    T, B, HIDP = hx.shape
    nc, fs = means.shape
    kernel = functools.partial(mu_update_kernel, momentum=float(momentum))
    return pl.pallas_call(
        kernel,
        out_shape=jax.ShapeDtypeStruct((nc, fs), jnp.float32),
        grid=(T,),
        in_specs=[
            pl.BlockSpec((1, B, HIDP),      lambda t: (t, 0, 0)),        # hx (precomputed)
            pl.BlockSpec((nc, fs),          lambda t: (0, 0)),           # means (input)
            pl.BlockSpec((1, nc, fs, HIDP), lambda t: (t, 0, 0, 0)),     # W1 means cols (bf16)
            pl.BlockSpec((1, HIDP, fs),     lambda t: (t, 0, 0)),        # W2 (bf16)
            pl.BlockSpec((1, 1, fs),        lambda t: (t, 0, 0)),        # b2
        ],
        out_specs=pl.BlockSpec((nc, fs), lambda t: (0, 0)),              # resident means
        compiler_params=pltpu.CompilerParams(dimension_semantics=("arbitrary",)),
    )(hx, means, params["w1m"], params["w2"], params["b2"])


def dynamic_distribution_forward(x, means, vars_, tc_inds, params, momentum):
    tids = jnp.asarray(list(tc_inds), dtype=jnp.int32)
    x_flat = conv_xflat_pallas(x, params)                               # (B, F), once
    hx = hx_pallas(x_flat, vars_, tids, params)                         # (T, B, HIDp)
    means_out = mu_momentum_update_pallas(hx, means, params, momentum)  # (nc, fs)
    return means_out, vars_


# ----------------------------- numpy reference ------------------------------

def reference_forward_np(x, means, vars_, tc_inds, p, momentum):
    x = np.asarray(x, np.float64)
    cw = np.asarray(p["conv_w"], np.float64)
    cb = np.asarray(p["conv_b"], np.float64)
    sc = np.asarray(p["bn_scale"], np.float64)
    sh = np.asarray(p["bn_shift"], np.float64)
    B, _, D, H, W = x.shape
    cout = cb.shape[0]
    xp = np.pad(x[:, 0], ((0, 0), (1, 1), (1, 1), (1, 1)))
    y = np.zeros((B, cout, D, H, W), np.float64)
    for co in range(cout):
        for kd in range(3):
            for kh in range(3):
                for kw in range(3):
                    y[:, co] += cw[co, 0, kd, kh, kw] * xp[:, kd:kd + D, kh:kh + H, kw:kw + W]
        y[:, co] = (y[:, co] + cb[co]) * sc[co] + sh[co]
    y = np.where(y >= 0.0, y, 0.01 * y)
    xf = y.reshape(B, -1)

    W1 = np.asarray(p["W1_full"], np.float64)
    b1 = np.asarray(p["b1_raw"], np.float64)
    W2 = np.asarray(p["W2_raw"], np.float64)
    b2 = np.asarray(p["b2_raw"], np.float64)
    m = np.asarray(means, np.float64).copy()
    v = np.asarray(vars_, np.float64)
    for t, tid in enumerate(tc_inds):
        inp = np.concatenate([np.tile(m.reshape(1, -1), (B, 1)),
                              np.tile(v.reshape(1, -1), (B, 1)),
                              np.full((B, 1), float(tid)),
                              xf], axis=-1)
        h = np.maximum(inp @ W1[t] + b1[t], 0.0)
        o = np.tanh(h @ W2[t] + b2[t])
        m[t] = (1.0 - momentum) * o.mean(0) + momentum * m[t]
    return m, np.asarray(vars_)


# --------------------------------- main --------------------------------------

if __name__ == "__main__":
    # small shapes consistent with the module
    B, D, H, W = 2, 4, 8, 8            # x: (B, 1, D, H, W); tp_dim = D*H*W
    COUT = 4                           # prompt_out_channel
    FS, NC, HID = 16, 3, 1000          # feature_space_dim, num_components, hidden_dim
    HIDP = 1024                        # hidden_dim zero-padded to a multiple of 128
    KTAPS_PAD = 32                     # 27 conv taps zero-padded to a multiple of 8
    MOMENTUM = 0.9
    TP = D * H * W                     # 256
    F = COUT * TP                      # 1024 (flattened prompt features)
    N_IN = FS * NC + NC + F + 1        # mu-module input dim
    tc_inds = [1, 0, 2]

    key = jax.random.PRNGKey(0)
    ks = jax.random.split(key, 14)

    # --- deterministic parameters (synthetic init; shapes follow __init__) ---
    conv_w = 0.3 * jax.random.normal(ks[0], (COUT, 1, 3, 3, 3), jnp.float32)
    conv_b = 0.1 * jax.random.normal(ks[1], (COUT,), jnp.float32)
    bn_gamma = 1.0 + 0.2 * jax.random.normal(ks[2], (COUT,), jnp.float32)
    bn_beta = 0.1 * jax.random.normal(ks[3], (COUT,), jnp.float32)
    bn_rmean = 0.1 * jax.random.normal(ks[4], (COUT,), jnp.float32)
    bn_rvar = 1.0 + 0.2 * jax.random.uniform(ks[5], (COUT,), jnp.float32)
    eps = 1e-5
    bn_scale = bn_gamma / jnp.sqrt(bn_rvar + eps)
    bn_shift = bn_beta - bn_rmean * bn_scale

    W1_full = jax.random.normal(ks[6], (NC, N_IN, HID), jnp.float32) / np.sqrt(N_IN)
    b1_all = 0.01 * jax.random.normal(ks[7], (NC, 1, HID), jnp.float32)
    W2_all = jax.random.normal(ks[8], (NC, HID, FS), jnp.float32) / np.sqrt(HID)
    b2_all = 0.01 * jax.random.normal(ks[9], (NC, 1, FS), jnp.float32)

    def pad_hid(a):                                   # zero-pad last dim HID -> HIDP (exact)
        return jnp.pad(a, [(0, 0)] * (a.ndim - 1) + [(0, HIDP - HID)])

    # conv weights with eval-BN folded in; K (27 taps) zero-padded to 32
    w_eff = conv_w.reshape(COUT, 27) * bn_scale[:, None]
    w_eff = jnp.pad(w_eff, ((0, 0), (0, KTAPS_PAD - 27)))
    b_eff = (conv_b * bn_scale + bn_shift).reshape(COUT, 1)

    params = {
        # kernel-side parameters
        "w_eff": w_eff, "b_eff": b_eff,
        # W1 split along its input dim to match torch.cat([means, vars, task_id, x], -1)
        "w1m": pad_hid(W1_full[:, :NC * FS, :]).reshape(NC, NC, FS, HIDP)
                   .astype(jnp.bfloat16),                                          # (NC,NC,FS,HIDP) bf16
        "w1v": pad_hid(W1_full[:, NC * FS:NC * FS + NC, :]),                       # (NC, 3, HIDP)  f32
        "w1t": pad_hid(W1_full[:, NC * FS + NC:NC * FS + NC + 1, :]),              # (NC, 1, HIDP)  f32
        "w1x": pad_hid(W1_full[:, NC * FS + NC + 1:, :]).astype(jnp.bfloat16),     # (NC, F, HIDP)  bf16
        "b1": pad_hid(b1_all),                                                     # (NC, 1, HIDP)  f32
        "w2": jnp.pad(W2_all, ((0, 0), (0, HIDP - HID), (0, 0))).astype(jnp.bfloat16),  # (NC, HIDP, FS) bf16
        "b2": b2_all,                                                              # (NC, 1, FS)    f32
        # reference-side (raw f32) parameters
        "conv_w": conv_w, "conv_b": conv_b, "bn_scale": bn_scale, "bn_shift": bn_shift,
        "W1_full": W1_full, "b1_raw": b1_all, "W2_raw": W2_all, "b2_raw": b2_all,
    }

    # --- deterministic inputs ---
    x = jax.random.normal(ks[10], (B, 1, D, H, W), jnp.float32)
    means = 0.5 * jax.random.normal(ks[11], (NC, FS), jnp.float32)
    vars_ = jax.random.uniform(ks[12], (NC,), jnp.float32, 0.5, 1.5)

    means_out, vars_out = dynamic_distribution_forward(x, means, vars_, tc_inds, params, MOMENTUM)
    means_out = jax.block_until_ready(means_out)
    vars_out = jax.block_until_ready(vars_out)

    ref_means, ref_vars = reference_forward_np(np.asarray(x), np.asarray(means),
                                               np.asarray(vars_), tc_inds, params, MOMENTUM)

    assert means_out.shape == (NC, FS) and means_out.dtype == jnp.float32
    # tolerance widened vs a pure-f32 kernel because W1_x / W1_m / W2 are stored
    # in bf16 (f32 accumulation); observed error is well below this bound.
    assert np.allclose(np.asarray(means_out), ref_means, rtol=5e-3, atol=5e-3), (
        np.max(np.abs(np.asarray(means_out) - ref_means)))
    assert np.allclose(np.asarray(vars_out), ref_vars)

    print("KERNEL_OK")
</pallas_src>

<mosaic_0001>
module attributes {stable_mosaic.version = 11 : i64} {
  func.func @conv_xflat_kernel(%arg0: memref<32x512xf32, #tpu.memory_space<vmem>>, %arg1: memref<4x32xf32, #tpu.memory_space<vmem>>, %arg2: memref<4x1xf32, #tpu.memory_space<vmem>>, %arg3: memref<2x1024xf32, #tpu.memory_space<vmem>>) attributes {dimension_semantics = [], scalar_prefetch = 0 : i64, scratch_operands = 0 : i64, tpu.core_type = #tpu.core_type<tc>} {
    %c0 = arith.constant 0 : index
    %c0_0 = arith.constant 0 : index
    %0 = vector.load %arg1[%c0, %c0_0] : memref<4x32xf32, #tpu.memory_space<vmem>>, vector<4x32xf32>
    %c0_1 = arith.constant 0 : index
    %c0_2 = arith.constant 0 : index
    %1 = vector.load %arg0[%c0_1, %c0_2] : memref<32x512xf32, #tpu.memory_space<vmem>>, vector<32x512xf32>
    %cst = arith.constant dense<0.000000e+00> : vector<4x512xf32>
    %2 = tpu.matmul %0, %1, %cst {dimension_numbers = #tpu.dot_dimension_numbers<[1], [0], [0], [1], [0, 0, 1, 1], [], []>} : vector<4x32xf32>, vector<32x512xf32>, vector<4x512xf32> -> vector<4x512xf32>
    %c0_3 = arith.constant 0 : index
    %c0_4 = arith.constant 0 : index
    %3 = vector.load %arg2[%c0_3, %c0_4] : memref<4x1xf32, #tpu.memory_space<vmem>>, vector<4x1xf32>
    %4 = vector.broadcast %3 : vector<4x1xf32> to vector<4x512xf32>
    %5 = arith.addf %2, %4 : vector<4x512xf32>
    %cst_5 = arith.constant 0.000000e+00 : f32
    %6 = vector.broadcast %cst_5 : f32 to vector<4x512xf32>
    %7 = arith.cmpf oge, %5, %6 : vector<4x512xf32>
    %cst_6 = arith.constant 0.00999999977 : f32
    %8 = vector.broadcast %cst_6 : f32 to vector<4x512xf32>
    %9 = arith.mulf %8, %5 : vector<4x512xf32>
    %10 = arith.select %7, %5, %9 : vector<4x512xi1>, vector<4x512xf32>
    %11 = vector.extract_strided_slice %10 {offsets = [0, 0], sizes = [1, 256], strides = [1, 1]} : vector<4x512xf32> to vector<1x256xf32>
    %c0_7 = arith.constant 0 : index
    %c0_8 = arith.constant 0 : index
    %12 = vector.load %arg3[%c0_7, %c0_8] : memref<2x1024xf32, #tpu.memory_space<vmem>>, vector<1x256xf32>
    tpu.vector_store %arg3[%c0_7, %c0_8], %11 {strides = array<i32>} : memref<2x1024xf32, #tpu.memory_space<vmem>>, vector<1x256xf32>,
    %13 = vector.extract_strided_slice %10 {offsets = [0, 256], sizes = [1, 256], strides = [1, 1]} : vector<4x512xf32> to vector<1x256xf32>
    %c1 = arith.constant 1 : index
    %c0_9 = arith.constant 0 : index
    %14 = vector.load %arg3[%c1, %c0_9] : memref<2x1024xf32, #tpu.memory_space<vmem>>, vector<1x256xf32>
    tpu.vector_store %arg3[%c1, %c0_9], %13 {strides = array<i32>} : memref<2x1024xf32, #tpu.memory_space<vmem>>, vector<1x256xf32>,
    %15 = vector.extract_strided_slice %10 {offsets = [1, 0], sizes = [1, 256], strides = [1, 1]} : vector<4x512xf32> to vector<1x256xf32>
    %c0_10 = arith.constant 0 : index
    %c256 = arith.constant 256 : index
    %16 = vector.load %arg3[%c0_10, %c256] : memref<2x1024xf32, #tpu.memory_space<vmem>>, vector<1x256xf32>
    tpu.vector_store %arg3[%c0_10, %c256], %15 {strides = array<i32>} : memref<2x1024xf32, #tpu.memory_space<vmem>>, vector<1x256xf32>,
    %17 = vector.extract_strided_slice %10 {offsets = [1, 256], sizes = [1, 256], strides = [1, 1]} : vector<4x512xf32> to vector<1x256xf32>
    %c1_11 = arith.constant 1 : index
    %c256_12 = arith.constant 256 : index
    %18 = vector.load %arg3[%c1_11, %c256_12] : memref<2x1024xf32, #tpu.memory_space<vmem>>, vector<1x256xf32>
    tpu.vector_store %arg3[%c1_11, %c256_12], %17 {strides = array<i32>} : memref<2x1024xf32, #tpu.memory_space<vmem>>, vector<1x256xf32>,
    %19 = vector.extract_strided_slice %10 {offsets = [2, 0], sizes = [1, 256], strides = [1, 1]} : vector<4x512xf32> to vector<1x256xf32>
    %c0_13 = arith.constant 0 : index
    %c512 = arith.constant 512 : index
    %20 = vector.load %arg3[%c0_13, %c512] : memref<2x1024xf32, #tpu.memory_space<vmem>>, vector<1x256xf32>
    tpu.vector_store %arg3[%c0_13, %c512], %19 {strides = array<i32>} : memref<2x1024xf32, #tpu.memory_space<vmem>>, vector<1x256xf32>,
    %21 = vector.extract_strided_slice %10 {offsets = [2, 256], sizes = [1, 256], strides = [1, 1]} : vector<4x512xf32> to vector<1x256xf32>
    %c1_14 = arith.constant 1 : index
    %c512_15 = arith.constant 512 : index
    %22 = vector.load %arg3[%c1_14, %c512_15] : memref<2x1024xf32, #tpu.memory_space<vmem>>, vector<1x256xf32>
    tpu.vector_store %arg3[%c1_14, %c512_15], %21 {strides = array<i32>} : memref<2x1024xf32, #tpu.memory_space<vmem>>, vector<1x256xf32>,
    %23 = vector.extract_strided_slice %10 {offsets = [3, 0], sizes = [1, 256], strides = [1, 1]} : vector<4x512xf32> to vector<1x256xf32>
    %c0_16 = arith.constant 0 : index
    %c768 = arith.constant 768 : index
    %24 = vector.load %arg3[%c0_16, %c768] : memref<2x1024xf32, #tpu.memory_space<vmem>>, vector<1x256xf32>
    tpu.vector_store %arg3[%c0_16, %c768], %23 {strides = array<i32>} : memref<2x1024xf32, #tpu.memory_space<vmem>>, vector<1x256xf32>,
    %25 = vector.extract_strided_slice %10 {offsets = [3, 256], sizes = [1, 256], strides = [1, 1]} : vector<4x512xf32> to vector<1x256xf32>
    %c1_17 = arith.constant 1 : index
    %c768_18 = arith.constant 768 : index
    %26 = vector.load %arg3[%c1_17, %c768_18] : memref<2x1024xf32, #tpu.memory_space<vmem>>, vector<1x256xf32>
    tpu.vector_store %arg3[%c1_17, %c768_18], %25 {strides = array<i32>} : memref<2x1024xf32, #tpu.memory_space<vmem>>, vector<1x256xf32>,
    return
  }
}

</mosaic_0001>

<bundles_post_ra>
// kernel: tpu_custom_call.1
= control target key start
LH: loop header
LB: loop body
LE: loop exit
PB: predicated region body
PF: predicated region fallthrough
CT: control target
= control target key end

     0   :  { %8 = vsyncpa [#allocation3], 0  ;;  %s457_s0 = inlined_call_operand.hbm [shape: f32[32,512], index: 0, kind: input, shape index: {}]   ;;  %s458_s1 = inlined_call_operand.vmem [shape: f32[4,32], index: 1, kind: input, shape index: {}]   ;;  %s459_s2 = inlined_call_operand.vmem [shape: f32[4,1], index: 2, kind: input, shape index: {}]   ;;  %s460_s3 = inlined_call_operand.hbm [shape: f32[2,1024], index: 3, kind: output, shape index: {}]  }
   0x1   :  { %9 = vsyncpa [#allocation4], 0  ;;  %s380_s12 = smov [#allocation2]   ;;  %s332_s16 = scalar_lea.hbm %s457_s0, 2048 }
   0x2   :  { %s15_s13 = sshll.u32 %s380_s12, 4  ;;  %p333_p0 = scmp.ne.s32.totalorder %s457_s0, %s332_s16  ;;  %s16_s13 = int_to_ptr.vmem [resolvable:$true] %s15_s13 }
   0x3   :  { %p336_p1 = scmp.lt.u32.totalorder %s332_s16, %s457_s0 }
   0x5   :  { %p338_p2 = pnand %p336_p1, %p333_p0 }
   0x7   :  { %341 = shalt.err (!%p338_p2)
}
   0x8   :  { %s342_s21 = scalar_lea.vmem %s16_s13, 2048  ;;  %p347_p4 = scmp.lt.s32.totalorder %s16_s13, %s16_s13 }
   0x9   :  { %p343_p3 = scmp.ne.s32.totalorder %s16_s13, %s342_s21  ;;  %p348_p5 = scmp.lt.s32.totalorder %s342_s21, %s342_s21 }
   0xb   :  { %p349_p6 = por %p348_p5, %p347_p4 }
   0xd   :  { %p350_p7 = pnand %p349_p6, %p343_p3 }
   0xf   :  { %353 = shalt.err (!%p350_p7)
}
  0x10   :  { %s381_s22 = smov 512   ;;  %s382_s23 = smov 32  }
  0x11   :  { %21 = dma.hbm_to_vmem [thread:$0]  %s457_s0, 2048, %s16_s13, [#allocation3], %s381_s22, %s381_s22, %s382_s23  }
  0x12   :  { %376 = dma.done.wait [#allocation3], 2048  }
  0x13   :  { %377 = vsyncadd [#allocation3], 4294965248  ;;  %v383_v0 = vmov 0.0   ;;  %v384_v1 = vmov 0   ;;  %v31_v2 = vld [vmem:[#allocation2 + $0x8] sm:$0xff]  ;;  %v33_v4 = vld [vmem:[#allocation2 + $0x18] sm:$0xff]  ;;  %v216_v30 = vlaneseq }
  0x14   :  { %120 = vmatprep.mubr.f32.mxu0 %v383_v0  ;;  %191 = vmatprep.mubr.f32.mxu1 %v383_v0  ;;  %v35_v3 = vld [vmem:[#allocation2 + $0x28] sm:$0xff]  ;;  %v37_v6 = vld [vmem:[#allocation2 + $0x38] sm:$0xff]  ;;  %v30_v7 = vld [vmem:[#allocation2] sm:$0xff]  ;;  %vm52_vm0 = vcmask 261120   ;;  %v385_v28 = vmov 1966171168  }
  0x15   :  { %331 = vset.pattern.permute.xlu0 %v384_v1  ;;  %v308_v5 = vpack.c.bf16 %v35_v3, %v31_v2  ;;  %v34_v8 = vld [vmem:[#allocation2 + $0x20] sm:$0xff]  ;;  %v316_v9 = vpack.c.bf16 %v37_v6, %v33_v4  ;;  %v32_v11 = vld [vmem:[#allocation2 + $0x10] sm:$0xff]  ;;  %v39_v13 = vld [vmem:[#allocation2 + $0x48] sm:$0xff]  ;;  %v214_v29 = vunpack.c.l.s4 %v385_v28  ;;  %v217_v37 = vshrl.u32 %v216_v30, 7 }
  0x16   :  { %v310_v10 = vpack.c.bf16 %v34_v8, %v30_v7  ;;  %v36_v12 = vld [vmem:[#allocation2 + $0x30] sm:$0xff]  ;;  %v43_v15 = vld [vmem:[#allocation2 + $0x68] sm:$0xff]  ;;  %v41_v16 = vld [vmem:[#allocation2 + $0x58] sm:$0xff]  ;;  %vm425_vm5 = vcmp.lt.s32.totalorder %v216_v30, 256 }
  0x17   :  { %309 = vmatprep.subr.bf16.mxu0 %v308_v5  ;;  %v318_v14 = vpack.c.bf16 %v36_v12, %v32_v11  ;;  %v45_v17 = vld [vmem:[#allocation2 + $0x78] sm:$0xff]  ;;  %317 = vmatprep.subr.bf16.mxu1 %v316_v9  ;;  %v312_v18 = vpack.c.bf16 %v43_v15, %v39_v13  ;;  %v38_v20 = vld [vmem:[#allocation2 + $0x40] sm:$0xff]  ;;  %v40_v22 = vld [vmem:[#allocation2 + $0x50] sm:$0xff]  ;;  %v215_v36 = vunpack.c.0.s8 %v214_v29 }
  0x18   :  { %311 = vmatpush1.bf16.msra.mxu0 %v310_v10  ;;  %v320_v19 = vpack.c.bf16 %v45_v17, %v41_v16  ;;  %v42_v21 = vld [vmem:[#allocation2 + $0x60] sm:$0xff]  ;;  %v44_v24 = vld [vmem:[#allocation2 + $0x70] sm:$0xff] }
  0x19   :  { %319 = vmatpush1.bf16.msra.mxu1 %v318_v14  ;;  %v314_v23 = vpack.c.bf16 %v42_v21, %v38_v20  ;;  %v46_v25 = vld [vmem:[%s459_s2] sm:$0xf]  ;;  %313 = vmatprep.subr.bf16.mxu0 %v312_v18  ;;  %v322_v26 = vpack.c.bf16 %v44_v24, %v40_v22  ;;  %v218_v46 = vsub.s32 %v215_v36, %v217_v37 }
  0x1a   :  { %321 = vmatprep.subr.bf16.mxu1 %v320_v19  ;;  %49 = vperm.xlu0 %331, %v46_v25   ;;  %v29_v27 = vld [vmem:[%s458_s1] sm:$0xf]  ;;  %s386_s1 = smov [#allocation5]  }
  0x1b   :  { %s297_s2 = sshll.u32 %s386_s1, 4  ;;  %s298_s2 = int_to_ptr.vmem [resolvable:$true] %s297_s2 }
  0x1c   :  { %315 = vmatpush1.bf16.msra.mxu0 %v314_v23  ;;  %s354_s29 = scalar_lea.vmem %s298_s2, 256  ;;  %p359_p9 = scmp.lt.s32.totalorder %s298_s2, %s298_s2 }
  0x1d   :  { %323 = vmatpush1.bf16.msra.mxu1 %v322_v26  ;;  %p355_p8 = scmp.ne.s32.totalorder %s298_s2, %s354_s29  ;;  %p360_p10 = scmp.lt.s32.totalorder %s354_s29, %s354_s29 }
  0x1f   :  { %306 = vmatmul.mubr.msk.f32.vlgmr.msra.gmra.mrb[0].mxu0 %vm52_vm0, %v29_v27  ;;  %p361_p11 = por %p360_p10, %p359_p9 }
  0x20   :  { %307 = vmatmul.mubr.msk.f32.vlgmr.msra.gmra.mrb[0].mxu1 %vm52_vm0, %v29_v27 }
  0x21   :  { %p362_p12 = pnand %p361_p11, %p355_p8 }
  0x99   :  { %v50_v31 = vpop.permute.xlu0 %49 }
  0xf2   :  { %v122_v32 = vpop.f32.mrb[0].mxu0 }
  0xf3   :  { %v123_v33 = vadd.f32 %v122_v32, %v50_v31  ;;  %v193_v34 = vpop.f32.mrb[0].mxu1  ;;  %v124_v35 = vpop.f32.mrb[1].mxu0 }
  0xf4   :  { %v194_v38 = vadd.f32 %v193_v34, %v50_v31  ;;  %v125_v39 = vadd.f32 %v124_v35, %v50_v31  ;;  %v195_v40 = vpop.f32.mrb[1].mxu1 }
  0xf5   :  { %vm198_vm1 = vcmp.ge.f32.partialorder %v123_v33, 0.0  ;;  %v202_v41 = vmul.f32 0.01, %v123_v33  ;;  %v196_v42 = vadd.f32 %v195_v40, %v50_v31 }
  0xf6   :  { %vm200_vm2 = vcmp.ge.f32.partialorder %v194_v38, 0.0  ;;  %v204_v43 = vmul.f32 0.01, %v194_v38  ;;  %vm199_vm3 = vcmp.ge.f32.partialorder %v125_v39, 0.0  ;;  %v203_v44 = vmul.f32 0.01, %v125_v39 }
  0xf7   :  { %v206_v45 = vsel %vm198_vm1, %v123_v33, %v202_v41  ;;  %vm201_vm4 = vcmp.ge.f32.partialorder %v196_v42, 0.0  ;;  %v205_v47 = vmul.f32 0.01, %v196_v42 }
  0xf8   :  { %v208_v48 = vsel %vm200_vm2, %v194_v38, %v204_v43  ;;  %v207_v49 = vsel %vm199_vm3, %v125_v39, %v203_v44 }
  0xf9   :  { %v212_v50 = vcombine.low %v206_v45, %v207_v49  ;;  %v209_v51 = vsel %vm201_vm4, %v196_v42, %v205_v47 }
  0xfa   :  { %v235_v52 = vcombine.low %v208_v48, %v209_v51 }
  0xfb   :  { %v219_v53 = vrot.slane %v212_v50, %v218_v46 }
  0xfc   :  { %v242_v55 = vrot.slane %v235_v52, %v218_v46 }
  0xfd   :  { %v226_v56 = vrot.slane %v219_v53, %v218_v46  ;;  %v253_v57 = vcombine.high %v219_v53, %v219_v53 }
  0xfe   :  { %v249_v58 = vrot.slane %v242_v55, %v218_v46  ;;  %v264_v59 = vcombine.high %v242_v55, %v242_v55 }
  0xff   :  { %232 = vst.msk [vmem:[#allocation5] ss:$2 sm:$0x3] %vm425_vm5, %v226_v56  ;;  %v260_v60 = vrot.slane %v253_v57, %v218_v46  ;;  %v275_v61 = vcombine.high %v226_v56, %v226_v56 }
 0x100   :  { %252 = vst.msk [vmem:[#allocation5 + $0x1] ss:$2 sm:$0x3] %vm425_vm5, %v249_v58  ;;  %v271_v62 = vrot.slane %v264_v59, %v218_v46  ;;  %v279_v63 = vcombine.high %v249_v58, %v249_v58 }
 0x101   :  { %263 = vst.msk [vmem:[#allocation5 + $0x4] ss:$2 sm:$0x3] %vm425_vm5, %v260_v60  ;;  %278 = vst.msk [vmem:[#allocation5 + $0x8] ss:$2 sm:$0x3] %vm425_vm5, %v275_v61  ;;  %v283_v0 = vcombine.high %v260_v60, %v260_v60 }
 0x102   :  { %274 = vst.msk [vmem:[#allocation5 + $0x5] ss:$2 sm:$0x3] %vm425_vm5, %v271_v62  ;;  %282 = vst.msk [vmem:[#allocation5 + $0x9] ss:$2 sm:$0x3] %vm425_vm5, %v279_v63  ;;  %v287_v1 = vcombine.high %v271_v62, %v271_v62 }
 0x103   :  { %286 = vst.msk [vmem:[#allocation5 + $0xc] ss:$2 sm:$0x3] %vm425_vm5, %v283_v0 }
 0x104   :  { %290 = vst.msk [vmem:[#allocation5 + $0xd] ss:$2 sm:$0x3] %vm425_vm5, %v287_v1 }
 0x105   :  { %365 = shalt.err (!%p362_p12)
}
 0x106   :  { %s366_s5 = scalar_lea.hbm %s460_s3, 256 }
 0x107   :  { %p367_p13 = scmp.ne.s32.totalorder %s460_s3, %s366_s5  ;;  %p370_p0 = scmp.lt.u32.totalorder %s366_s5, %s460_s3 }
 0x109   :  { %p372_p1 = pnand %p370_p0, %p367_p13 }
 0x10b   :  { %375 = shalt.err (!%p372_p1)
}
 0x10c   :  { %300 = dma.vmem_to_hbm [thread:$0]  %s298_s2, 256, %s460_s3, [#allocation4]  }
 0x10d   :  { %378 = dma.done.wait [#allocation4], 256  }
 0x10e   :  { %379 = vsyncadd [#allocation4], 4294967040 }
 0x10f   :  { %304 = vsyncpa [#allocation3], 1 }
 0x110   :  { %305 = vsyncpa [#allocation4], 1 }

</bundles_post_ra>
